<compile_context>
chip_gen: v5e
topology: v5e:2x2
jax: 0.10.0
libtpu: 0.0.40
codegen_flags: <defaults>
</compile_context>

<pallas_src>
import jax
import jax.numpy as jnp
from jax.experimental import pallas as pl
from jax.experimental.pallas import tpu as pltpu  # noqa: F401  (TPU backend)


def _netarray_fused_kernel(x_ref, w1_ref, b1_ref, w2_ref, b2_ref, o_ref):
    # x_ref : (B, D_in)          -- shared input, DMA'd once
    # w1_ref: (D_in, N*H)        -- per-net W1 concatenated along lanes
    # b1_ref: (1, N*H)
    # w2_ref: (N*H, N*NOUT)      -- block-diagonal second layer
    # b2_ref: (1, N*NOUT)
    # o_ref : (B, N*NOUT)        -- column-concatenated subnet outputs
    h = jnp.dot(x_ref[...], w1_ref[...],
                preferred_element_type=jnp.float32) + b1_ref[...]
    h = jnp.tanh(h)                                  # EUP transcendental
    y = jnp.dot(h, w2_ref[...],
                preferred_element_type=jnp.float32) + b2_ref[...]
    o_ref[...] = y.astype(o_ref.dtype)               # one full-width store


def netarray_forward(x, w1, b1, w2, b2):
    """Pallas implementation of NetArray.forward for stacked identical subnets.

    x : (B, D_in) float32
    w1: (N, D_in, H), b1: (N, H), w2: (N, H, NOUT), b2: (N, NOUT)
    returns (B, N * NOUT) float32 -- column-concatenation of subnet outputs,
    matching torch's output[:, i*NOUT:(i+1)*NOUT] = net_i(x).
    """
    num_nets, d_in, hidden = w1.shape
    nout = w2.shape[2]
    batch = x.shape[0]
    total_hidden = num_nets * hidden
    total_out = num_nets * nout

    # ---- one-time fused layouts (wrapper-side, pure data movement) ----
    # First layer: concatenate per-net W1 along the output (lane) axis.
    w1_cat = jnp.transpose(w1, (1, 0, 2)).reshape(d_in, total_hidden)
    b1_cat = b1.reshape(1, total_hidden)
    # Second layer: block-diagonal so each net only sees its own hidden block.
    w2_bd = jnp.zeros((total_hidden, total_out), dtype=jnp.float32)
    for i in range(num_nets):
        w2_bd = w2_bd.at[i * hidden:(i + 1) * hidden,
                         i * nout:(i + 1) * nout].set(w2[i])
    b2_cat = b2.reshape(1, total_out)

    flops = 2 * batch * (d_in * total_hidden + total_hidden * total_out)
    bytes_accessed = 4 * (x.size + w1_cat.size + b1_cat.size
                          + w2_bd.size + b2_cat.size + batch * total_out)
    cost = pl.CostEstimate(flops=flops,
                           transcendentals=batch * total_hidden,
                           bytes_accessed=bytes_accessed)

    # Single invocation: no grid, full-array blocks resident in VMEM.
    return pl.pallas_call(
        _netarray_fused_kernel,
        out_shape=jax.ShapeDtypeStruct((batch, total_out), jnp.float32),
        cost_estimate=cost,
    )(x, w1_cat, b1_cat, w2_bd, b2_cat)


def _reference_forward(x, w1, b1, w2, b2):
    # Pure-JAX reference mirroring the PyTorch per-net loop.
    outs = []
    for i in range(w1.shape[0]):
        h = jnp.tanh(x @ w1[i] + b1[i])
        outs.append(h @ w2[i] + b2[i])
    return jnp.concatenate(outs, axis=1)


if __name__ == "__main__":
    # Small shapes consistent with NetArray: nmv=16, npass=16 -> nin=D_in=32.
    BATCH, D_IN, HIDDEN, NOUT, NUM_NETS = 8, 32, 32, 8, 3

    key = jax.random.PRNGKey(0)
    kx, k1, k2, k3, k4 = jax.random.split(key, 5)

    x = jax.random.normal(kx, (BATCH, D_IN), dtype=jnp.float32)
    w1 = jax.random.normal(k1, (NUM_NETS, D_IN, HIDDEN), dtype=jnp.float32) * 0.1
    b1 = jax.random.normal(k2, (NUM_NETS, HIDDEN), dtype=jnp.float32) * 0.1
    w2 = jax.random.normal(k3, (NUM_NETS, HIDDEN, NOUT), dtype=jnp.float32) * 0.1
    b2 = jax.random.normal(k4, (NUM_NETS, NOUT), dtype=jnp.float32) * 0.1

    y = netarray_forward(x, w1, b1, w2, b2)
    y = jax.block_until_ready(y)

    y_ref = _reference_forward(x, w1, b1, w2, b2)
    assert y.shape == (BATCH, NUM_NETS * NOUT), y.shape
    assert jnp.allclose(y, y_ref, atol=1e-5, rtol=1e-5), "mismatch vs reference"

    print("KERNEL_OK")
</pallas_src>

<mosaic_0001>
module attributes {stable_mosaic.version = 11 : i64} {
  func.func @_netarray_fused_kernel(%arg0: memref<8x32xf32, #tpu.memory_space<vmem>>, %arg1: memref<32x96xf32, #tpu.memory_space<vmem>>, %arg2: memref<1x96xf32, #tpu.memory_space<vmem>>, %arg3: memref<96x24xf32, #tpu.memory_space<vmem>>, %arg4: memref<1x24xf32, #tpu.memory_space<vmem>>, %arg5: memref<8x24xf32, #tpu.memory_space<vmem>>) attributes {dimension_semantics = [], scalar_prefetch = 0 : i64, scratch_operands = 0 : i64, tpu.core_type = #tpu.core_type<tc>} {
    %c0 = arith.constant 0 : index
    %c0_0 = arith.constant 0 : index
    %0 = vector.load %arg0[%c0, %c0_0] : memref<8x32xf32, #tpu.memory_space<vmem>>, vector<8x32xf32>
    %c0_1 = arith.constant 0 : index
    %c0_2 = arith.constant 0 : index
    %1 = vector.load %arg1[%c0_1, %c0_2] : memref<32x96xf32, #tpu.memory_space<vmem>>, vector<32x96xf32>
    %cst = arith.constant dense<0.000000e+00> : vector<8x96xf32>
    %2 = tpu.matmul %0, %1, %cst {dimension_numbers = #tpu.dot_dimension_numbers<[1], [0], [0], [1], [0, 0, 1, 1], [], []>} : vector<8x32xf32>, vector<32x96xf32>, vector<8x96xf32> -> vector<8x96xf32>
    %c0_3 = arith.constant 0 : index
    %c0_4 = arith.constant 0 : index
    %3 = vector.load %arg2[%c0_3, %c0_4] : memref<1x96xf32, #tpu.memory_space<vmem>>, vector<1x96xf32>
    %4 = vector.broadcast %3 : vector<1x96xf32> to vector<8x96xf32>
    %5 = arith.addf %2, %4 : vector<8x96xf32>
    %6 = math.tanh %5 : vector<8x96xf32>
    %c0_5 = arith.constant 0 : index
    %c0_6 = arith.constant 0 : index
    %7 = vector.load %arg3[%c0_5, %c0_6] : memref<96x24xf32, #tpu.memory_space<vmem>>, vector<96x24xf32>
    %cst_7 = arith.constant dense<0.000000e+00> : vector<8x24xf32>
    %8 = tpu.matmul %6, %7, %cst_7 {dimension_numbers = #tpu.dot_dimension_numbers<[1], [0], [0], [1], [0, 0, 1, 1], [], []>} : vector<8x96xf32>, vector<96x24xf32>, vector<8x24xf32> -> vector<8x24xf32>
    %c0_8 = arith.constant 0 : index
    %c0_9 = arith.constant 0 : index
    %9 = vector.load %arg4[%c0_8, %c0_9] : memref<1x24xf32, #tpu.memory_space<vmem>>, vector<1x24xf32>
    %10 = vector.broadcast %9 : vector<1x24xf32> to vector<8x24xf32>
    %11 = arith.addf %8, %10 : vector<8x24xf32>
    %c0_10 = arith.constant 0 : index
    %c0_11 = arith.constant 0 : index
    %12 = vector.load %arg5[%c0_10, %c0_11] : memref<8x24xf32, #tpu.memory_space<vmem>>, vector<8x24xf32>
    tpu.vector_store %arg5[%c0_10, %c0_11], %11 {strides = array<i32>} : memref<8x24xf32, #tpu.memory_space<vmem>>, vector<8x24xf32>,
    return
  }
}

</mosaic_0001>

<bundles_post_ra>
// kernel: tpu_custom_call.1
= control target key start
LH: loop header
LB: loop body
LE: loop exit
PB: predicated region body
PF: predicated region fallthrough
CT: control target
= control target key end

     0   :  { %vm30_vm0 = vcmask 261120   ;;  %s237_s0 = inlined_call_operand.vmem [shape: f32[8,32], index: 0, kind: input, shape index: {}]   ;;  %s238_s1 = inlined_call_operand.vmem [shape: f32[32,96], index: 1, kind: input, shape index: {}]   ;;  %s239_s2 = inlined_call_operand.vmem [shape: f32[1,96], index: 2, kind: input, shape index: {}]   ;;  %s240_s3 = inlined_call_operand.vmem [shape: f32[96,24], index: 3, kind: input, shape index: {}]   ;;  %s241_s4 = inlined_call_operand.vmem [shape: f32[1,24], index: 4, kind: input, shape index: {}]   ;;  %s242_s5 = inlined_call_operand.hbm [shape: f32[8,24], index: 5, kind: output, shape index: {}]  }
   0x1   :  { %v25_v0 = vld [vmem:[%s238_s1 + $0x18] sm:$0xff]  ;;  %v24_v1 = vld [vmem:[%s238_s1 + $0x10] sm:$0xff]  ;;  %v23_v3 = vld [vmem:[%s238_s1 + $0x8] sm:$0xff] }
   0x2   :  { %46 = vmatpush.msra.mxu0 %v25_v0  ;;  %v66_v2 = vld [vmem:[%s240_s3 + $0x58] sm:$0xff]  ;;  %v65_v4 = vld [vmem:[%s240_s3 + $0x50] sm:$0xff]  ;;  %v64_v5 = vld [vmem:[%s240_s3 + $0x48] sm:$0xff] }
   0x3   :  { %79 = vmatpush.msra.mxu1 %v66_v2  ;;  %v22_v6 = vld [vmem:[%s238_s1] sm:$0xff] }
   0x4   :  { %47 = vmatpush.msra.mxu0 %v24_v1  ;;  %v21_v7 = vld [vmem:[%s237_s0] sm:$0xff] }
   0x5   :  { %80 = vmatpush.msra.mxu1 %v65_v4  ;;  %v63_v8 = vld [vmem:[%s240_s3 + $0x40] sm:$0xff] }
   0x6   :  { %48 = vmatpush.msra.mxu0 %v23_v3 }
   0x7   :  { %10 = vsyncpa [#allocation3], 0  ;;  %81 = vmatpush.msra.mxu1 %v64_v5  ;;  %v62_v9 = vld [vmem:[%s240_s3 + $0x38] sm:$0xff]  ;;  %v61_v10 = vld [vmem:[%s240_s3 + $0x30] sm:$0xff]  ;;  %vm71_vm1 = vcmask 785408   ;;  %s146_s29 = smov [#allocation2]  }
   0x8   :  { %49 = vmatpush.msra.mxu0 %v22_v6  ;;  %v60_v11 = vld [vmem:[%s240_s3 + $0x28] sm:$0xff]  ;;  %v59_v12 = vld [vmem:[%s240_s3 + $0x20] sm:$0xff]  ;;  %v58_v13 = vld [vmem:[%s240_s3 + $0x18] sm:$0xff]  ;;  %s102_s30 = sshll.u32 %s146_s29, 4  ;;  %s104_s7 = sshll.u32 %s242_s5, 4  ;;  %vm95_vm2 = vcmask 195584   ;;  %s103_s30 = int_to_ptr.vmem [resolvable:$true] %s102_s30  ;;  %s105_s7 = int_to_ptr.hbm [resolvable:$true] %s104_s7 }
   0x9   :  { %113 = vmatmul.msk.f32.vlgmr.msra.gmra.mxu0 %vm30_vm0, %v21_v7  ;;  %82 = vmatpush.msra.mxu1 %v63_v8  ;;  %v57_v14 = vld [vmem:[%s240_s3 + $0x10] sm:$0xff]  ;;  %v56_v15 = vld [vmem:[%s240_s3 + $0x8] sm:$0xff]  ;;  %v55_v16 = vld [vmem:[%s240_s3] sm:$0xff] }
   0xa   :  { %v116_v17 = vld [vmem:[%s239_s2] ss:$0 sm:$0xff] }
   0xb   :  { %83 = vmatpush.msra.mxu1 %v62_v9  ;;  %v117_v21 = vld [vmem:[%s241_s4] ss:$0 sm:$0xff] }
   0xd   :  { %84 = vmatpush.msra.mxu1 %v61_v10 }
   0xf   :  { %85 = vmatpush.msra.mxu1 %v60_v11 }
  0x11   :  { %86 = vmatpush.msra.mxu1 %v59_v12 }
  0x13   :  { %87 = vmatpush.msra.mxu1 %v58_v13 }
  0x15   :  { %88 = vmatpush.msra.mxu1 %v57_v14 }
  0x17   :  { %89 = vmatpush.msra.mxu1 %v56_v15 }
  0x19   :  { %90 = vmatpush.msra.mxu1 %v55_v16 }
  0x86   :  { %v51_v18 = vpop.f32.mrf.mxu0 }
  0x87   :  { %v52_v19 = vadd.f32 %v116_v17, %v51_v18 }
  0x89   :  { %118 = vtanh.f32 %v52_v19 }
  0x8f   :  { %v119_v20 = vpop.eup %118 }
  0x90   :  { %114 = vmatmul.msk.f32.vlgmr.msra.gmra.mxu1 %vm71_vm1, %v119_v20 }
 0x10d   :  { %v92_v22 = vpop.f32.mrf.mxu1 }
 0x10e   :  { %v93_v23 = vadd.f32 %v117_v21, %v92_v22 }
 0x110   :  { %96 = vst.msk [vmem:[#allocation2] sm:$0xff] %vm95_vm2, %v93_v23 }
 0x111   :  { %107 = dma.vmem_to_hbm [thread:$0]  %s103_s30, 128, %s105_s7, [#allocation3]  }
 0x112   :  { %144 = dma.done.wait [#allocation3], 128  }
 0x113   :  { %145 = vsyncadd [#allocation3], 4294967168 }
 0x114   :  { %112 = vsyncpa [#allocation3], 1 }

</bundles_post_ra>
